<compile_context>
chip_gen: v7x
topology: tpu7x:2x2x1
jax: 0.10.0
libtpu: 0.0.40
codegen_flags: <defaults>
</compile_context>

<pallas_src>
import math

import jax
import jax.numpy as jnp
from jax.experimental import pallas as pl
from jax.experimental.pallas import tpu as pltpu


def _vdropout_kernel(mask_ref, expand_ref, x_ref, o_ref):
    # mask_ref:    (TN, V)    f32, 0/1 per vector channel
    # expand_ref:  (V, V*D)   f32, channel -> lane expansion, pre-scaled by 1/(1-p)
    # x_ref/o_ref: (TN, V*D)  x.dtype, channel-major flattening of (TN, V, D)
    mask_lanes = jnp.dot(mask_ref[...], expand_ref[...],
                         preferred_element_type=jnp.float32)      # (TN, V*D)
    o_ref[...] = x_ref[...] * mask_lanes.astype(o_ref.dtype)


def _pick_tile_rows(n_rows: int, row_bytes: int, target_bytes: int = 1 << 20) -> int:
    # ~1 MiB per x tile; with input + output double-buffered that is ~4 MiB resident,
    # comfortably inside the default scoped VMEM on v5e (16 MiB) / v6e / v7x (32 MiB).
    tn = max(8, (target_bytes // max(row_bytes, 1)) // 8 * 8)
    return n_rows if tn >= n_rows else tn


def vdropout(x, drop_rate, key, training=True, *, tile_rows=None):
    """Vector-channel dropout.  x: (..., V, D); all D components of a channel drop together."""
    if (not training) or drop_rate == 0.0:
        return x
    assert x.ndim >= 2, "expected x of shape (..., V, D)"
    keep = 1.0 - float(drop_rate)
    inv_keep = 1.0 / keep

    *lead, V, D = x.shape
    N = math.prod(lead) if lead else 1

    # One Bernoulli(keep) sample per vector channel (= x.shape[:-1]), drawn in XLA.
    # TODO(synk): use pltpu.prng_seed/prng_random_bits with per-block seeding once the
    # interpret/CPU path supports them; that would remove this small auxiliary array.
    mask = jax.random.bernoulli(key, p=keep, shape=x.shape[:-1])
    mask = mask.astype(jnp.float32).reshape(N, V)

    # Constant channel->lane expansion matrix with the scale folded in:
    #   expand[v, v*D + k] = 1/keep,  else 0.
    expand = jnp.repeat(jnp.eye(V, dtype=jnp.float32), D, axis=1) * inv_keep  # (V, V*D)

    x2 = x.reshape(N, V * D)     # free, contiguous reshape; lane dim = V*D (lane-dense)

    if tile_rows is None:
        tn = _pick_tile_rows(N, V * D * x2.dtype.itemsize)
    else:
        tn = N if int(tile_rows) >= N else max(8, (int(tile_rows) // 8) * 8)

    grid = (pl.cdiv(N, tn),)

    out2 = pl.pallas_call(
        _vdropout_kernel,
        out_shape=jax.ShapeDtypeStruct((N, V * D), x.dtype),
        grid=grid,
        in_specs=[
            pl.BlockSpec((tn, V), lambda i: (i, 0)),        # mask tile
            pl.BlockSpec((V, V * D), lambda i: (0, 0)),     # expansion matrix (stays resident)
            pl.BlockSpec((tn, V * D), lambda i: (i, 0)),    # x tile
        ],
        out_specs=pl.BlockSpec((tn, V * D), lambda i: (i, 0)),
        compiler_params=pltpu.CompilerParams(
            dimension_semantics=("parallel",),
        ),
    )(mask, expand, x2)

    return out2.reshape(x.shape)


if __name__ == "__main__":
    # The torch module's only parameter is an empty dummy (device anchor) -> nothing to init.
    drop_rate = 0.25
    N, V, D = 64, 32, 3                       # nodes, vector channels, xyz

    root = jax.random.PRNGKey(0)
    kx, kmask = jax.random.split(root)
    x = jax.random.normal(kx, (N, V, D), dtype=jnp.float32)

    # tile_rows=16 -> 4 grid steps, exercising the tiled / pipelined path.
    out = vdropout(x, drop_rate, kmask, training=True, tile_rows=16)
    out = jax.block_until_ready(out)

    # Every element is either dropped (0) or scaled by 1/(1-p), and all D components
    # of a vector channel are kept / dropped together.
    scaled = x / (1.0 - drop_rate)
    is_kept = jnp.isclose(out, scaled, atol=1e-5)
    is_dropped = out == 0.0
    assert bool(jnp.all(is_kept | is_dropped)), "elements not 0 or x/(1-p)"
    kept_channel = jnp.all(is_kept, axis=-1)
    dropped_channel = jnp.all(is_dropped, axis=-1)
    assert bool(jnp.all(kept_channel | dropped_channel)), "channel components not dropped together"
    assert out.shape == x.shape and out.dtype == x.dtype

    # Keep fraction should be near keep_prob=0.75 (loose statistical bound over N*V channels).
    keep_frac = float(jnp.mean(kept_channel.astype(jnp.float32)))
    assert 0.55 < keep_frac < 0.92, f"implausible keep fraction {keep_frac}"

    # Eval mode is the identity.
    assert bool(jnp.all(vdropout(x, drop_rate, kmask, training=False) == x))

    print("KERNEL_OK")
</pallas_src>

<mosaic_0001>
module attributes {stable_mosaic.version = 11 : i64} {
  func.func @_vdropout_kernel(%arg0: i32, %arg1: memref<16x32xf32, #tpu.memory_space<vmem>>, %arg2: memref<32x96xf32, #tpu.memory_space<vmem>>, %arg3: memref<16x96xf32, #tpu.memory_space<vmem>>, %arg4: memref<16x96xf32, #tpu.memory_space<vmem>>) attributes {dimension_semantics = [#tpu.dimension_semantics<parallel>], iteration_bounds = array<i64: 4>, scalar_prefetch = 0 : i64, scratch_operands = 0 : i64, tpu.core_type = #tpu.core_type<tc>, window_params = [{transform_indices = @transform_0, window_bounds = array<i64: 16, 32>}, {pipeline_mode = #tpu.pipeline_mode<synchronous>, transform_indices = @transform_1, window_bounds = array<i64: 32, 96>}, {transform_indices = @transform_2, window_bounds = array<i64: 16, 96>}, {transform_indices = @transform_3, window_bounds = array<i64: 16, 96>}]} {
    %c0 = arith.constant 0 : index
    %c0_0 = arith.constant 0 : index
    %0 = vector.load %arg1[%c0, %c0_0] : memref<16x32xf32, #tpu.memory_space<vmem>>, vector<16x32xf32>
    %c0_1 = arith.constant 0 : index
    %c0_2 = arith.constant 0 : index
    %1 = vector.load %arg2[%c0_1, %c0_2] : memref<32x96xf32, #tpu.memory_space<vmem>>, vector<32x96xf32>
    %cst = arith.constant dense<0.000000e+00> : vector<16x96xf32>
    %2 = tpu.matmul %0, %1, %cst {dimension_numbers = #tpu.dot_dimension_numbers<[1], [0], [0], [1], [0, 0, 1, 1], [], []>} : vector<16x32xf32>, vector<32x96xf32>, vector<16x96xf32> -> vector<16x96xf32>
    %c0_3 = arith.constant 0 : index
    %c0_4 = arith.constant 0 : index
    %3 = vector.load %arg3[%c0_3, %c0_4] : memref<16x96xf32, #tpu.memory_space<vmem>>, vector<16x96xf32>
    %4 = arith.mulf %3, %2 : vector<16x96xf32>
    %c0_5 = arith.constant 0 : index
    %c0_6 = arith.constant 0 : index
    %5 = vector.load %arg4[%c0_5, %c0_6] : memref<16x96xf32, #tpu.memory_space<vmem>>, vector<16x96xf32>
    tpu.vector_store %arg4[%c0_5, %c0_6], %4 {strides = array<i32>} : memref<16x96xf32, #tpu.memory_space<vmem>>, vector<16x96xf32>,
    return
  }
  func.func @transform_0(%arg0: i32) -> (i32, i32) {
    %c0_i32 = arith.constant 0 : i32
    %c0_i32_0 = arith.constant 0 : i32
    return %arg0, %c0_i32 : i32, i32
  }
  func.func @transform_1(%arg0: i32) -> (i32, i32) {
    %c0_i32 = arith.constant 0 : i32
    %c0_i32_0 = arith.constant 0 : i32
    %c0_i32_1 = arith.constant 0 : i32
    return %c0_i32, %c0_i32_0 : i32, i32
  }
  func.func @transform_2(%arg0: i32) -> (i32, i32) {
    %c0_i32 = arith.constant 0 : i32
    %c0_i32_0 = arith.constant 0 : i32
    return %arg0, %c0_i32 : i32, i32
  }
  func.func @transform_3(%arg0: i32) -> (i32, i32) {
    %c0_i32 = arith.constant 0 : i32
    %c0_i32_0 = arith.constant 0 : i32
    return %arg0, %c0_i32 : i32, i32
  }
}

</mosaic_0001>

<bundles_post_ra>
// kernel: tpu_custom_call.1
= control target key start
LH: loop header
LB: loop body
LE: loop exit
PB: predicated region body
PF: predicated region fallthrough
CT: control target
= control target key end

     0   :  { %8 = vsyncpa [#allocation3], 0  ;;  %s664_s0 = inlined_call_operand.vmem [shape: f32[64,32], index: 0, kind: input, shape index: {}]   ;;  %s665_s1 = inlined_call_operand.vmem [shape: f32[32,96], index: 1, kind: input, shape index: {}]   ;;  %s666_s2 = inlined_call_operand.vmem [shape: f32[64,96], index: 2, kind: input, shape index: {}]   ;;  %s667_s3 = inlined_call_operand.hbm [shape: f32[64,96], index: 3, kind: output, shape index: {}]  }
   0x1   :  { %10 = vsyncpa [#allocation3 + $0x1], 0  ;;  %s547_s12 = smov 0   ;;  %s549_s13 = smov 0  }
   0x2   :  { %s551_s14 = smov 0   ;;  %s553_s15 = smov 0  }
   0x3 LB: > { %s568_s16 = sadd.s32 4294967295, %s522_s15   ;;  %s377_s17 = sadd.s32 4294967294, %s522_s15   ;;  %s522_s15 = sphi %s553_s15, %s673_s15   ;;  %s518_s14 = sphi %s551_s14, %s672_s14   ;;  %s514_s13 = sphi %s549_s13, %s671_s13   ;;  %s510_s12 = sphi %s547_s12, %s670_s12  }
   0x4   : > { %s572_s18 = sadd.s32 1, %s522_s15   ;;  %s96_s19 = sadd.s32 1, %s518_s14 }
   0x5   : > { %s93_s20 = ssub.s32 %s522_s15, %s572_s18  ;;  %p106_p0 = scmp.ne.s32.totalorder %s518_s14, %s514_s13 }
   0x6   : > { %p94_p1 = scmp.eq.s32.totalorder %s93_s20, 0  ;;  %p107_p2 = scmp.eq.s32.totalorder %s568_s16, 3 }
   0x7   : > { %p112_p3 = scmp.ne.s32.totalorder %s514_s13, %s510_s12  ;;  %p113_p4 = scmp.eq.s32.totalorder %s377_s17, 3 }
   0x8   : > { %s583_s21 = scalar_select %p94_p1, %s518_s14, %s96_s19  }
   0x9   : > { %p585_p5 = por %p107_p2, %p106_p0  ;;  %p589_p6 = por %p113_p4, %p112_p3 }
   0xa   : > { %p380_p7 = scmp.ge.s32.totalorder %s522_s15, 1  ;;  %p152_p8 = scmp.lt.s32.totalorder %s522_s15, 5 }
   0xc   : > { %p153_p9 = pnand %p380_p7, %p152_p8 }
   0xd   : > { %v196_v0 = vld [vmem:[%s665_s1] sm:$0xff] (!%p153_p9)  ;;  %v197_v1 = vld [vmem:[%s665_s1 + $0x8] sm:$0xff] (!%p153_p9)  ;;  %v198_v2 = vld [vmem:[%s665_s1 + $0x10] sm:$0xff] (!%p153_p9)  ;;  %s382_s30 = sshll.u32 (!%p153_p9), %s568_s16, 1  ;;  %vm200_vm0 = vcmask (!%p153_p9), 261120   ;;  %s178_s10 = sand.u32 (!%p153_p9), 1, %s514_s13  }
   0xe   : > { %156 = sbr.rel (%p153_p9) target bundleno = 256 (0x100), region = 32  ;;  %v411_v3 = vpack.c.bf16 (!%p153_p9), %v197_v1, %v196_v0  ;;  %v199_v4 = vld [vmem:[%s665_s1 + $0x18] sm:$0xff] (!%p153_p9)  ;;  %p182_p10 = scmp.lt.s32.totalorder (!%p153_p9), %s382_s30, 7  ;;  %vm286_vm1 = vcmask (!%p153_p9), 785408  }
   0xf   : > { %v415_v5 = vpack.c.bf16 (!%p153_p9), %v199_v4, %v198_v2  ;;  %s381_s11 = sshll.u32 (!%p153_p9), %s178_s10, 4  ;;  %s393_s26 = sshll.u32 (!%p153_p9), %s568_s16, 8 }
  0x10   : > { %412 = vmatprep.subr.bf16.mxu0 (!%p153_p9), %v411_v3  ;;  %s180_s24 = scalar_lea.vmem (!%p153_p9), [#allocation2], %s381_s11  ;;  %s621_s29 = scalar_lea.hbm (!%p153_p9), %s667_s3, %s393_s26 }
  0x11   : > { %414 = vmatpush3.bf16.msra.mxu0 (!%p153_p9), %v411_v3  ;;  %s303_s25 = sshll.u32 (!%p153_p9), %s180_s24, 4  ;;  %s524_s4 = smov (!%p153_p9), [#allocation2]   ;;  %s616_s25 = int_to_ptr.vmem [resolvable:$true] %s303_s25 }
  0x12   : > { %416 = vmatprep.subr.bf16.mxu0 (!%p153_p9), %v415_v5  ;;  %s460_s16 = scalar_lea.vmem (!%p153_p9), %s616_s25, 256  ;;  %s464_s5 = sshll.u32 (!%p153_p9), %s524_s4, 4  ;;  %s465_s5 = int_to_ptr.vmem [resolvable:$false] %s464_s5 }
  0x13   : > { %p461_p11 = scmp.ne.s32.totalorder (!%p153_p9), %s616_s25, %s460_s16  ;;  %p467_p0 = scmp.lt.s32.totalorder (!%p153_p9), %s616_s25, %s465_s5 }
  0x15   : > { %s675_s30 = smov (!%p182_p10, %s382_s30), 7  ;;  %418 = vmatpush3.bf16.msra.mxu0 %v415_v5  ;;  %p462_p12 = pnand %p461_p11, %p585_p5 }
  0x16   : > { %s383_s6 = sshll.u32 %s675_s30, 3  ;;  %s623_s30 = scalar_lea.sflag [#allocation3], %s178_s10 }
  0x17   : > { %s185_s9 = scalar_lea.vmem %s664_s0, %s383_s6  ;;  %s191_s20 = scalar_lea.vmem %s666_s2, %s383_s6 }
  0x18   : > { %v194_v6 = vld [vmem:[%s185_s9] sm:$0xff]  ;;  %v195_v7 = vld [vmem:[%s185_s9 + $0x8] sm:$0xff]  ;;  %p463_p13 = pneg %p462_p12  ;;  %s466_s6 = scalar_lea.vmem %s465_s5, 512 }
  0x19   : > { %408 = vmatprep.mubr.msk.f32.mxu0 %vm200_vm0, %v194_v6  ;;  %v283_v8 = vld [vmem:[%s191_s20 + $0x8] sm:$0xff]  ;;  %v282_v9 = vld [vmem:[%s191_s20] sm:$0xff]  ;;  %p468_p1 = scmp.lt.s32.totalorder %s466_s6, %s460_s16 }
  0x1a   : > { %409 = vmatmul.mubr.msk.f32.vlgmr.msra.gmra.mrb[0].mxu0 %vm200_vm0, %v195_v7 }
  0x1b   : > { %p469_p2 = por %p468_p1, %p467_p0 }
  0x1d   : > { %p470_p3 = pnand %p469_p2, %p463_p13 }
  0xed   : > { %v410_v10 = vpop.f32.mrb[0].mxu0 }
  0xee   : > { %v285_v11 = vmul.f32 %v410_v10, %v283_v8  ;;  %v273_v12 = vpop.f32.mrb[1].mxu0 }
  0xef   : > { %v284_v13 = vmul.f32 %v282_v9, %v273_v12 }
  0xf0   : > { %288 = vst.msk [vmem:[%s180_s24 + $0x8] sm:$0xff] %vm286_vm1, %v285_v11 }
  0xf1   : > { %287 = vst.msk [vmem:[%s180_s24] sm:$0xff] %vm286_vm1, %v284_v13 }
  0xf2   : > { %473 = shalt.err (!%p470_p3)
}
  0xf3   : > { %s474_s7 = scalar_lea.hbm %s621_s29, 256  ;;  %s478_s10 = scalar_lea.hbm %s667_s3, 1024 }
  0xf4   : > { %p475_p4 = scmp.ne.s32.totalorder %s621_s29, %s474_s7  ;;  %p479_p9 = scmp.lt.u32.totalorder %s621_s29, %s667_s3 }
  0xf5   : > { %p480_p10 = scmp.lt.u32.totalorder %s478_s10, %s474_s7  ;;  %p482_p12 = scmp.lt.u32.totalorder %s474_s7, %s621_s29 }
  0xf6   : > { %p476_p7 = pnand %p475_p4, %p585_p5 }
  0xf7   : > { %p481_p11 = por %p480_p10, %p479_p9 }
  0xf8   : > { %p477_p8 = pneg %p476_p7 }
  0xf9   : > { %p483_p13 = por %p482_p12, %p481_p11 }
  0xfb   : > { %p484_p0 = pnand %p483_p13, %p477_p8 }
  0xfd   : > { %487 = shalt.err (!%p484_p0)
}
  0xfe   : > { %s525_s19 = smov 128   ;;  %s526_s20 = smov 8  }
  0xff   : > { %419 = dma.vmem_to_hbm [thread:$0]  (%p585_p5), %s616_s25, 256, %s621_s29, %s623_s30, %s525_s19, %s525_s19, %s526_s20  }
 0x100 PF: > { %p425_p1 = scmp.ge.s32.totalorder %s522_s15, 2  ;;  %s318_s24 = sand.u32 1, %s510_s12  }
 0x101   : > { %s319_s26 = scalar_lea.sflag [#allocation3], %s318_s24 }
 0x102   : > { %p422_p2 = pnand %p425_p1, %p589_p6 }
 0x104   : > { %505 = dma.done.wait (!%p422_p2), %s319_s26, 256  }
 0x105   : > { %507 = vsyncadd (!%p422_p2), %s319_s26, 4294967040  ;;  %p13_p3 = scmp.ge.s32.totalorder %s572_s18, 6   ;;  %s670_s12 = smov %s514_s13 }
 0x106   : > { %s671_s13 = smov %s518_s14  ;;  %s672_s14 = smov %s583_s21 }
 0x107   : > { %s673_s15 = smov %s572_s18  ;;  %15 = sbr.rel (!%p13_p3) target bundleno = 3 (0x3), region = 70 }
 0x10e   :  { %324 = vsyncpa [#allocation3], 1 }
 0x10f   :  { %326 = vsyncpa [#allocation3 + $0x1], 1 }

</bundles_post_ra>
